<compile_context>
chip_gen: v6e
topology: v6e:2x2x1
jax: 0.10.0
libtpu: 0.0.40
codegen_flags: <defaults>
</compile_context>

<pallas_src>
import jax
import jax.numpy as jnp
from jax.experimental import pallas as pl
from jax.experimental.pallas import tpu as pltpu

_MiB = 1024 * 1024
# Conservative tile budget: double-buffered tiles must fit v7x's 64 MiB VMEM
# per TensorCore (v5e/v6e have 128 MiB and simply get extra headroom).
_VMEM_TILE_BUDGET = 40 * _MiB
_ROW_TILE_CAP = 1024


def _round_up(a, m):
    return (a + m - 1) // m * m


# ---------------------------------------------------------------------------
# Kernels
# ---------------------------------------------------------------------------
def _residual_fullw_kernel(x_ref, w_ref, b_ref, o_ref):
    """1-D row grid; W fully resident (fetched from HBM exactly once).

    x_ref: (tm, Dp) f32   activations (MXU LHS *and* residual source)
    w_ref: (Dp, Dp) bf16  full weight (constant block index -> single DMA)
    b_ref: (1, Dp)  f32   bias
    o_ref: (tm, Dp)       output
    """
    x = x_ref[...]
    y = jnp.dot(x.astype(jnp.bfloat16), w_ref[...],
                preferred_element_type=jnp.float32)
    # Bias + residual in f32; single fused store.
    o_ref[...] = (y + b_ref[...] + x).astype(o_ref.dtype)


def _residual_coltile_kernel(xl_ref, xr_ref, w_ref, b_ref, o_ref):
    """2-D (rows, cols) grid for large D.

    xl_ref: (tm, Dp) bf16  LHS, pre-cast in the wrapper, resident across cols
    xr_ref: (tm, tn) f32   residual slice (kept f32 for precision)
    w_ref : (Dp, tn) bf16  weight column tile
    b_ref : (1, tn)  f32   bias tile
    o_ref : (tm, tn)       output tile
    """
    y = jnp.dot(xl_ref[...], w_ref[...], preferred_element_type=jnp.float32)
    o_ref[...] = (y + b_ref[...] + xr_ref[...]).astype(o_ref.dtype)


# ---------------------------------------------------------------------------
# Wrapper
# ---------------------------------------------------------------------------
def prepare_residual_params(w, b):
    """Pad + bf16-cast the weights ONCE (hoisted out of the per-call path)."""
    D = w.shape[0]
    Dp = _round_up(D, 128)
    wp = jnp.pad(w, ((0, Dp - D), (0, Dp - D))).astype(jnp.bfloat16)
    bp = jnp.pad(b.astype(jnp.float32), (0, Dp - D)).reshape(1, Dp)
    return wp, bp


def residual_forward(x, wp, bp, *, tile_rows=None):
    """x: [B, N, D]; wp: [Dp, Dp] bf16; bp: [1, Dp] f32 (from prepare_residual_params).

    Returns fn(x) + x with fn = x @ W + b, in x.dtype.
    """
    B, N, D = x.shape
    M = B * N
    Dp = wp.shape[0]
    out_bytes = x.dtype.itemsize

    # ---- path + tile selection -------------------------------------------
    full_w_bytes = 2 * Dp * Dp * 2                       # double-buffered bf16 W
    use_full_w = full_w_bytes <= _VMEM_TILE_BUDGET // 2  # small/medium D

    if use_full_w:
        tn = Dp
        per_row = 2 * Dp * 4 + 2 * Dp * out_bytes        # f32 x + out, 2x buffered
        budget_rows = (_VMEM_TILE_BUDGET - full_w_bytes) // per_row
    else:
        tn = 256 if Dp % 256 == 0 else 128
        w_tile_bytes = 2 * Dp * tn * 2
        per_row = 2 * Dp * 2 + 2 * tn * 4 + 2 * tn * out_bytes
        budget_rows = (_VMEM_TILE_BUDGET - w_tile_bytes) // per_row

    if tile_rows is not None:
        tm = tile_rows
    else:
        tm = min(_ROW_TILE_CAP, max(8, (budget_rows // 8) * 8), _round_up(M, 8))
    tm = max(8, (tm // 8) * 8)
    Mp = _round_up(M, tm)

    # ---- pad activations only when ragged ----------------------------------
    x2 = x.reshape(M, D)
    if Mp != M or Dp != D:
        x2 = jnp.pad(x2, ((0, Mp - M), (0, Dp - D)))

    # ---- VMEM limit from the real double-buffered footprint ----------------
    if use_full_w:
        footprint = (full_w_bytes + 2 * tm * Dp * 4
                     + 2 * tm * Dp * out_bytes + 2 * Dp * 4)
    else:
        footprint = (2 * Dp * tn * 2 + 2 * tm * Dp * 2 + 2 * tm * tn * 4
                     + 2 * tm * tn * out_bytes + 2 * tn * 4)
    vmem_limit = int(min(max(footprint + 4 * _MiB, 16 * _MiB), 48 * _MiB))

    flops = 2 * Mp * Dp * Dp

    if use_full_w:
        bytes_acc = (Mp * Dp * 4            # x read once (LHS + residual)
                     + Dp * Dp * 2          # W read exactly once
                     + Dp * 4               # bias
                     + Mp * Dp * out_bytes)  # output write
        out2 = pl.pallas_call(
            _residual_fullw_kernel,
            out_shape=jax.ShapeDtypeStruct((Mp, Dp), x.dtype),
            grid_spec=pltpu.PrefetchScalarGridSpec(
                num_scalar_prefetch=0,
                grid=(Mp // tm,),
                in_specs=[
                    pl.BlockSpec((tm, Dp), lambda i: (i, 0)),  # x (LHS + residual)
                    pl.BlockSpec((Dp, Dp), lambda i: (0, 0)),  # W, constant block
                    pl.BlockSpec((1, Dp), lambda i: (0, 0)),   # bias, constant block
                ],
                out_specs=pl.BlockSpec((tm, Dp), lambda i: (i, 0)),
            ),
            compiler_params=pltpu.CompilerParams(
                dimension_semantics=("parallel",),
                vmem_limit_bytes=vmem_limit,
            ),
            cost_estimate=pl.CostEstimate(
                flops=flops, transcendentals=0, bytes_accessed=bytes_acc),
        )(x2, wp, bp)
    else:
        xl = x2.astype(jnp.bfloat16)        # pre-cast LHS once (halves LHS traffic)
        bytes_acc = (Mp * Dp * 2                      # bf16 LHS
                     + Mp * Dp * 4                    # f32 residual
                     + (Mp // tm) * Dp * Dp * 2       # W column tiles per row tile
                     + Dp * 4                         # bias
                     + Mp * Dp * out_bytes)           # output write
        out2 = pl.pallas_call(
            _residual_coltile_kernel,
            out_shape=jax.ShapeDtypeStruct((Mp, Dp), x.dtype),
            grid_spec=pltpu.PrefetchScalarGridSpec(
                num_scalar_prefetch=0,
                grid=(Mp // tm, Dp // tn),
                in_specs=[
                    pl.BlockSpec((tm, Dp), lambda i, j: (i, 0)),  # bf16 LHS, resident over j
                    pl.BlockSpec((tm, tn), lambda i, j: (i, j)),  # f32 residual slice
                    pl.BlockSpec((Dp, tn), lambda i, j: (0, j)),  # W column tile
                    pl.BlockSpec((1, tn), lambda i, j: (0, j)),   # bias tile
                ],
                out_specs=pl.BlockSpec((tm, tn), lambda i, j: (i, j)),
            ),
            compiler_params=pltpu.CompilerParams(
                # Row axis only is megacore-sharded: avoids both v7x cores
                # DMAing the same full-width LHS row tile.
                dimension_semantics=("parallel", "arbitrary"),
                vmem_limit_bytes=vmem_limit,
            ),
            cost_estimate=pl.CostEstimate(
                flops=flops, transcendentals=0, bytes_accessed=bytes_acc),
        )(xl, x2, wp, bp)

    return out2[:M, :D].reshape(B, N, D)


if __name__ == "__main__":
    # Small deterministic example: batch=2, seq=8, hidden=32.
    B, N, D = 2, 8, 32
    key = jax.random.PRNGKey(0)
    kx, kw, kb = jax.random.split(key, 3)
    x = jax.random.normal(kx, (B, N, D), dtype=jnp.float32)
    w = jax.random.normal(kw, (D, D), dtype=jnp.float32) * 0.02
    b = jax.random.normal(kb, (D,), dtype=jnp.float32) * 0.02

    wp, bp = prepare_residual_params(w, b)  # one-time pad + bf16 cast
    out = jax.block_until_ready(residual_forward(x, wp, bp))

    # Pure-JAX reference: fn(x) + x
    ref = jnp.einsum("bnd,de->bne", x, w) + b + x
    assert out.shape == x.shape and out.dtype == x.dtype
    # bf16 MXU inputs with f32 accumulation: tolerance relaxed accordingly.
    assert jnp.allclose(out, ref, atol=1e-2, rtol=1e-2), "mismatch vs reference"

    print("KERNEL_OK")
</pallas_src>

<mosaic_0001>
module attributes {stable_mosaic.version = 11 : i64} {
  func.func @_residual_fullw_kernel(%arg0: i32, %arg1: memref<16x128xf32, #tpu.memory_space<vmem>>, %arg2: memref<128x128xbf16, #tpu.memory_space<vmem>>, %arg3: memref<1x128xf32, #tpu.memory_space<vmem>>, %arg4: memref<16x128xf32, #tpu.memory_space<vmem>>) attributes {dimension_semantics = [#tpu.dimension_semantics<parallel>], iteration_bounds = array<i64: 1>, scalar_prefetch = 0 : i64, scratch_operands = 0 : i64, tpu.core_type = #tpu.core_type<tc>, window_params = [{transform_indices = @transform_0, window_bounds = array<i64: 16, 128>}, {pipeline_mode = #tpu.pipeline_mode<synchronous>, transform_indices = @transform_1, window_bounds = array<i64: 128, 128>}, {pipeline_mode = #tpu.pipeline_mode<synchronous>, transform_indices = @transform_2, window_bounds = array<i64: 1, 128>}, {transform_indices = @transform_3, window_bounds = array<i64: 16, 128>}]} {
    %c0 = arith.constant 0 : index
    %c0_0 = arith.constant 0 : index
    %0 = vector.load %arg1[%c0, %c0_0] : memref<16x128xf32, #tpu.memory_space<vmem>>, vector<16x128xf32>
    %1 = arith.truncf %0 : vector<16x128xf32> to vector<16x128xbf16>
    %c0_1 = arith.constant 0 : index
    %c0_2 = arith.constant 0 : index
    %2 = vector.load %arg2[%c0_1, %c0_2] : memref<128x128xbf16, #tpu.memory_space<vmem>>, vector<128x128xbf16>
    %cst = arith.constant dense<0.000000e+00> : vector<16x128xf32>
    %3 = tpu.matmul %1, %2, %cst {dimension_numbers = #tpu.dot_dimension_numbers<[1], [0], [0], [1], [0, 0, 1, 1], [], []>} : vector<16x128xbf16>, vector<128x128xbf16>, vector<16x128xf32> -> vector<16x128xf32>
    %c0_3 = arith.constant 0 : index
    %c0_4 = arith.constant 0 : index
    %4 = vector.load %arg3[%c0_3, %c0_4] : memref<1x128xf32, #tpu.memory_space<vmem>>, vector<1x128xf32>
    %5 = vector.broadcast %4 : vector<1x128xf32> to vector<16x128xf32>
    %6 = arith.addf %3, %5 : vector<16x128xf32>
    %7 = arith.addf %6, %0 : vector<16x128xf32>
    %c0_5 = arith.constant 0 : index
    %c0_6 = arith.constant 0 : index
    %8 = vector.load %arg4[%c0_5, %c0_6] : memref<16x128xf32, #tpu.memory_space<vmem>>, vector<16x128xf32>
    tpu.vector_store %arg4[%c0_5, %c0_6], %7 {strides = array<i32>} : memref<16x128xf32, #tpu.memory_space<vmem>>, vector<16x128xf32>,
    return
  }
  func.func @transform_0(%arg0: i32) -> (i32, i32) {
    %c0_i32 = arith.constant 0 : i32
    %c0_i32_0 = arith.constant 0 : i32
    return %arg0, %c0_i32 : i32, i32
  }
  func.func @transform_1(%arg0: i32) -> (i32, i32) {
    %c0_i32 = arith.constant 0 : i32
    %c0_i32_0 = arith.constant 0 : i32
    %c0_i32_1 = arith.constant 0 : i32
    return %c0_i32, %c0_i32_0 : i32, i32
  }
  func.func @transform_2(%arg0: i32) -> (i32, i32) {
    %c0_i32 = arith.constant 0 : i32
    %c0_i32_0 = arith.constant 0 : i32
    %c0_i32_1 = arith.constant 0 : i32
    return %c0_i32, %c0_i32_0 : i32, i32
  }
  func.func @transform_3(%arg0: i32) -> (i32, i32) {
    %c0_i32 = arith.constant 0 : i32
    %c0_i32_0 = arith.constant 0 : i32
    return %arg0, %c0_i32 : i32, i32
  }
}

</mosaic_0001>

<bundles_post_ra>
// kernel: tpu_custom_call.1
= control target key start
LH: loop header
LB: loop body
LE: loop exit
PB: predicated region body
PF: predicated region fallthrough
CT: control target
= control target key end

     0   :  { %8 = vsyncpa [#allocation3], 0  ;;  %s349_s0 = inlined_call_operand.hbm [shape: f32[16,128], index: 0, kind: input, shape index: {}]   ;;  %s350_s1 = inlined_call_operand.hbm [shape: bf16[128,128], index: 1, kind: input, shape index: {}]   ;;  %s351_s2 = inlined_call_operand.vmem [shape: f32[1,128], index: 2, kind: input, shape index: {}]   ;;  %s352_s3 = inlined_call_operand.hbm [shape: f32[16,128], index: 3, kind: output, shape index: {}]  }
   0x1   :  { %9 = vsyncpa [#allocation6], 0 }
   0x2   :  { %10 = vsyncpa [#allocation4], 0  ;;  %s302_s12 = smov [#allocation2]  }
   0x3   :  { %s16_s13 = sshll.u32 %s302_s12, 4  ;;  %s17_s13 = int_to_ptr.vmem [resolvable:$true] %s16_s13 }
   0x4   :  { %s244_s14 = scalar_lea.vmem %s17_s13, 256  ;;  %p249_p1 = scmp.lt.s32.totalorder %s17_s13, %s17_s13 }
   0x5   :  { %p245_p0 = scmp.ne.s32.totalorder %s17_s13, %s244_s14  ;;  %p250_p2 = scmp.lt.s32.totalorder %s244_s14, %s244_s14 }
   0x7   :  { %p251_p3 = por %p250_p2, %p249_p1 }
   0x9   :  { %p252_p4 = pnand %p251_p3, %p245_p0 }
   0xb   :  { %255 = shalt.err (!%p252_p4)
}
   0xc   :  { %s303_s15 = smov 128   ;;  %s304_s16 = smov 8  }
   0xd   :  { %22 = dma.hbm_to_vmem [thread:$0]  %s349_s0, 256, %s17_s13, [#allocation3], %s303_s15, %s303_s15, %s304_s16  }
   0xe   :  { %s305_s19 = smov [#allocation5]  }
   0xf   :  { %s28_s20 = sshll.u32 %s305_s19, 4  ;;  %s29_s20 = int_to_ptr.vmem [resolvable:$true] %s28_s20 }
  0x10   :  { %s264_s21 = scalar_lea.vmem %s29_s20, 1024  ;;  %p269_p6 = scmp.lt.s32.totalorder %s29_s20, %s29_s20 }
  0x11   :  { %p265_p5 = scmp.ne.s32.totalorder %s29_s20, %s264_s21  ;;  %p270_p7 = scmp.lt.s32.totalorder %s264_s21, %s264_s21 }
  0x13   :  { %p271_p8 = por %p270_p7, %p269_p6 }
  0x15   :  { %p272_p9 = pnand %p271_p8, %p265_p5 }
  0x17   :  { %275 = shalt.err (!%p272_p9)
}
  0x18   :  { %s306_s22 = smov 64   ;;  %s307_s23 = smov 4  }
  0x19   :  { %34 = dma.hbm_to_vmem [thread:$0]  %s350_s1, 1024, %s29_s20, [#allocation6], %s306_s22, %s306_s22, %s307_s23  }
  0x1a   :  { %296 = dma.done.wait [#allocation3], 256  }
  0x1b   :  { %297 = vsyncadd [#allocation3], 4294967040 }
  0x1c   :  { %298 = dma.done.wait [#allocation6], 1024  }
  0x1d   :  { %299 = vsyncadd [#allocation6], 4294966272  ;;  %v308_v0 = vmov 0.0   ;;  %vm309_vm0 = vmmov 0   ;;  %v228_v1 = vld [vmem:[#allocation5 + $0x38] sm:$0xff]   ;;  %v229_v2 = vld [vmem:[#allocation5 + $0x30] sm:$0xff]  }
  0x1e   :  { %199 = vmatprep.subr.bf16.mxu0 %v308_v0  ;;  %215 = vmatprep.mubr.msk.bf16.mxu0 %vm309_vm0, %v308_v0  ;;  %v230_v3 = vld [vmem:[#allocation5 + $0x28] sm:$0xff]   ;;  %v231_v4 = vld [vmem:[#allocation5 + $0x20] sm:$0xff]   ;;  %v232_v5 = vld [vmem:[#allocation5 + $0x18] sm:$0xff]   ;;  %s310_s26 = smov [#allocation7]  }
  0x1f   :  { %200 = vmatpush3.bf16.msra.mxu0 %v228_v1  ;;  %v233_v6 = vld [vmem:[#allocation5 + $0x10] sm:$0xff]   ;;  %v234_v7 = vld [vmem:[#allocation5 + $0x8] sm:$0xff]   ;;  %v235_v8 = vld [vmem:[#allocation5] sm:$0xff]   ;;  %s168_s27 = sshll.u32 %s310_s26, 4  ;;  %s169_s27 = int_to_ptr.vmem [resolvable:$true] %s168_s27 }
  0x20   :  { %201 = vmatprep.subr.bf16.mxu0 %v308_v0  ;;  %v44_v9 = vld [vmem:[#allocation2] sm:$0xff]  ;;  %v45_v10 = vld [vmem:[#allocation2 + $0x8] sm:$0xff]  ;;  %s276_s28 = scalar_lea.vmem %s169_s27, 256  ;;  %p281_p11 = scmp.lt.s32.totalorder %s169_s27, %s169_s27 }
  0x21   :  { %v46_v11 = vpack.c.bf16 %v45_v10, %v44_v9  ;;  %v181_v12 = vld [vmem:[%s351_s2] ss:$0 sm:$0xff]  ;;  %p277_p10 = scmp.ne.s32.totalorder %s169_s27, %s276_s28  ;;  %p282_p12 = scmp.lt.s32.totalorder %s276_s28, %s276_s28 }
  0x23   :  { %202 = vmatpush3.bf16.msra.mxu0 %v229_v2  ;;  %p283_p13 = por %p282_p12, %p281_p11 }
  0x24   :  { %203 = vmatprep.subr.bf16.mxu0 %v308_v0 }
  0x25   :  { %p284_p0 = pnand %p283_p13, %p277_p10 }
  0x27   :  { %204 = vmatpush3.bf16.msra.mxu0 %v230_v3 }
  0x28   :  { %205 = vmatprep.subr.bf16.mxu0 %v308_v0 }
  0x2b   :  { %206 = vmatpush3.bf16.msra.mxu0 %v231_v4 }
  0x2c   :  { %207 = vmatprep.subr.bf16.mxu0 %v308_v0 }
  0x2f   :  { %208 = vmatpush3.bf16.msra.mxu0 %v232_v5 }
  0x30   :  { %209 = vmatprep.subr.bf16.mxu0 %v308_v0 }
  0x33   :  { %210 = vmatpush3.bf16.msra.mxu0 %v233_v6 }
  0x34   :  { %211 = vmatprep.subr.bf16.mxu0 %v308_v0 }
  0x37   :  { %212 = vmatpush3.bf16.msra.mxu0 %v234_v7 }
  0x38   :  { %213 = vmatprep.subr.bf16.mxu0 %v308_v0 }
  0x3b   :  { %214 = vmatpush3.bf16.msra.mxu0 %v235_v8 }
  0x3e   :  { %216 = vmatmul.mubr.bf16.vlgmr.msra.gmra.mxu0 %v46_v11 }
  0xfe   :  { %v152_v13 = vpop.f32.mrf.mxu0 }
  0xff   :  { %v153_v14 = vadd.f32 %v181_v12, %v152_v13 }
 0x100   :  { %v217_v15 = vpop.f32.mrf.mxu0 }
 0x101   :  { %v159_v16 = vadd.f32 %v153_v14, %v44_v9 }
 0x102   :  { %v155_v17 = vpop.f32.mrf.mxu0 }
 0x103   :  { %161 = vst [vmem:[#allocation7] sm:$0xff] %v159_v16  ;;  %v156_v18 = vadd.f32 %v181_v12, %v155_v17 }
 0x104   :  { %v218_v19 = vpop.f32.mrf.mxu0 }
 0x105   :  { %v160_v20 = vadd.f32 %v156_v18, %v45_v10 }
 0x107   :  { %162 = vst [vmem:[#allocation7 + $0x8] sm:$0xff] %v160_v20 }
 0x108   :  { %287 = shalt.err (!%p284_p0)
}
 0x109   :  { %174 = dma.vmem_to_hbm [thread:$0]  %s169_s27, 256, %s352_s3, [#allocation4], %s303_s15, %s303_s15, %s304_s16  }
 0x10a   :  { %300 = dma.done.wait [#allocation4], 256  }
 0x10b   :  { %301 = vsyncadd [#allocation4], 4294967040 }
 0x10c   :  { %178 = vsyncpa [#allocation3], 1 }
 0x10d   :  { %179 = vsyncpa [#allocation6], 1 }
 0x10e   :  { %180 = vsyncpa [#allocation4], 1 }

</bundles_post_ra>
